<compile_context>
chip_gen: v6e
topology: v6e:2x2x1
jax: 0.10.0
libtpu: 0.0.40
codegen_flags: <defaults>
</compile_context>

<pallas_src>
import numpy as np
import jax
import jax.numpy as jnp
from jax.experimental import pallas as pl
from jax.experimental.pallas import tpu as pltpu

_LANE = 128


def _round_up(x, m):
    return ((x + m - 1) // m) * m


# ----------------------------------------------------------------------------
# Wrapper-side constant construction (host numpy + tiny XLA ops, done once)
# ----------------------------------------------------------------------------
def _row_select(k, Ho, Hi, stride, pad):
    """R[i, oh, h] = 1 iff h == stride*oh + i - pad (zero row => zero padding)."""
    r = np.zeros((k, Ho, Hi), np.float32)
    for i in range(k):
        for oh in range(Ho):
            h = stride * oh + i - pad
            if 0 <= h < Hi:
                r[i, oh, h] = 1.0
    return r


def _col_placement(k, Wo, Wi, stride, pad):
    """P[w, j, ow] = 1 iff w == stride*ow + j - pad (missing entry => zero pad)."""
    p = np.zeros((Wi, k, Wo), np.float32)
    for j in range(k):
        for ow in range(Wo):
            w = stride * ow + j - pad
            if 0 <= w < Wi:
                p[w, j, ow] = 1.0
    return p


def _conv_operands(w, scale, shift, Hi, Wi, *, stride, pad, pad_out):
    """ConvBlock (conv+folded-BN) as matmul operands for the (H, W*C) layout.

    w: (k, k, Cin, Cout).  Returns dict with:
      R  : (k, Ho, Hi)            bf16 row-tap 0/1 selection
      WM : (k, Wi*Cin, width_p)   bf16 column-Toeplitz with BN scale folded in
      sh : (1, width_p)           f32  tiled BN shift
    """
    k, cin, cout = int(w.shape[0]), int(w.shape[2]), int(w.shape[3])
    Ho = (Hi + 2 * pad - k) // stride + 1
    Wo = (Wi + 2 * pad - k) // stride + 1
    width = Wo * cout
    width_p = _round_up(width, _LANE) if pad_out else width

    wf = w * scale[None, None, None, :]                       # fold BN scale
    P = jnp.asarray(_col_placement(k, Wo, Wi, stride, pad))   # (Wi, k, Wo)
    WM = jnp.einsum("wjo,ijcd->iwcod", P, wf).reshape(k, Wi * cin, width)
    WM = jnp.pad(WM, ((0, 0), (0, 0), (0, width_p - width))).astype(jnp.bfloat16)
    R = jnp.asarray(_row_select(k, Ho, Hi, stride, pad)).astype(jnp.bfloat16)
    sh = jnp.pad(jnp.tile(shift, Wo), (0, width_p - width))
    sh = sh.reshape(1, width_p).astype(jnp.float32)
    return dict(R=R, WM=WM, sh=sh, Ho=Ho, Wo=Wo, width=width, width_p=width_p)


def _pool_operands(Hi, Wi, C, *, k, stride):
    """Exact 0/1 selection matrices for a kxk stride-s max pool in (H, W*C) layout."""
    Ho = (Hi - k) // stride + 1
    Wo = (Wi - k) // stride + 1
    Pr = (Ho - 1) * stride + 1
    Pc = (Wo - 1) * stride + 1
    width = Wo * C
    width_p = _round_up(width, _LANE)
    csel = np.zeros((Pc * C, width_p), np.float32)
    for ow in range(Wo):
        for c in range(C):
            csel[(stride * ow) * C + c, ow * C + c] = 1.0
    rsel = np.zeros((Ho, Pr), np.float32)
    for oh in range(Ho):
        rsel[oh, stride * oh] = 1.0
    return dict(csel=jnp.asarray(csel), rsel=jnp.asarray(rsel),
                Ho=Ho, Wo=Wo, Pr=Pr, Pc=Pc, width=width, width_p=width_p)


# ----------------------------------------------------------------------------
# The fused Pallas kernel
# ----------------------------------------------------------------------------
def _make_kernel(C, k_pool, Pr, Pc):
    f32, bf16 = jnp.float32, jnp.bfloat16

    def _conv(inp_bf, r_ref, wm_ref, sh_ref):
        # ConvBlock: sum over row taps of (R_i @ X) @ T_i, then +shift, ReLU.
        k = r_ref.shape[0]
        acc = None
        for i in range(k):
            rows = jnp.dot(r_ref[i], inp_bf, preferred_element_type=f32)
            part = jnp.dot(rows.astype(bf16), wm_ref[i],
                           preferred_element_type=f32)
            acc = part if acc is None else acc + part
        return jnp.maximum(acc + sh_ref[...], 0.0)

    def kernel(x_ref, r1, wm1, sh1, wm2a, sh2a, r2b, wm2b, sh2b,
               r2c, wm2c, sh2c, csel, rsel, o_ref):
        x = x_ref[...]                                  # (H, W*C) f32
        xb = x.astype(bf16)

        # branch 1: ConvBlock 3x3 / stride 2 / valid
        y1 = _conv(xb, r1, wm1, sh1)                    # (Ho, 128)

        # branch 2: ConvBlock 1x1 -> ConvBlock 3x3 s1 p1 -> ConvBlock 3x3 s2
        a = jnp.dot(xb, wm2a[...], preferred_element_type=f32) + sh2a[...]
        a = jnp.maximum(a, 0.0)                         # (H, W*c5x5_in)
        b = _conv(a.astype(bf16), r2b, wm2b, sh2b)      # (H, W*c5x5_out)
        y2 = _conv(b.astype(bf16), r2c, wm2c, sh2c)     # (Ho, 128)

        # branch 3: MaxPool 3x3 / stride 2 (exact, f32)
        m = x[:, 0:Pc * C]
        for j in range(1, k_pool):
            m = jnp.maximum(m, x[:, j * C:j * C + Pc * C])
        m = jnp.dot(m, csel[...], preferred_element_type=f32)     # (H, 128)
        m2 = m[0:Pr, :]
        for i in range(1, k_pool):
            m2 = jnp.maximum(m2, m[i:i + Pr, :])
        y3 = jnp.dot(rsel[...], m2, preferred_element_type=f32)   # (Ho, 128)

        # single lane-dense store of the concatenated slab
        o_ref[...] = jnp.concatenate([y1, y2, y3], axis=1)

    return kernel


# ----------------------------------------------------------------------------
# Forward pass (NCHW in, NCHW out — matches the PyTorch module)
# ----------------------------------------------------------------------------
def reduction_a_forward(x_nchw, params):
    N, Cin, H, W = x_nchw.shape
    x = jnp.transpose(x_nchw, (0, 2, 3, 1)).astype(jnp.float32)   # NHWC
    x_mat = x.reshape(N, H, W * Cin)                              # (N, H, W*C)

    p1, p2a, p2b, p2c = params["b1"], params["b2a"], params["b2b"], params["b2c"]

    b1 = _conv_operands(p1["w"], p1["scale"], p1["shift"], H, W,
                        stride=2, pad=0, pad_out=True)
    b2a = _conv_operands(p2a["w"], p2a["scale"], p2a["shift"], H, W,
                         stride=1, pad=0, pad_out=False)
    b2b = _conv_operands(p2b["w"], p2b["scale"], p2b["shift"], H, W,
                         stride=1, pad=1, pad_out=False)
    b2c = _conv_operands(p2c["w"], p2c["scale"], p2c["shift"], H, W,
                         stride=2, pad=0, pad_out=True)
    mp = _pool_operands(H, W, Cin, k=3, stride=2)

    Ho, Wo = b1["Ho"], b1["Wo"]
    assert b2c["Ho"] == Ho and mp["Ho"] == Ho
    out_lanes = b1["width_p"] + b2c["width_p"] + mp["width_p"]

    kernel = _make_kernel(C=Cin, k_pool=3, Pr=mp["Pr"], Pc=mp["Pc"])

    wm2a_2d = b2a["WM"][0]        # 1x1 conv needs no row taps

    operands = (x_mat,
                b1["R"], b1["WM"], b1["sh"],
                wm2a_2d, b2a["sh"],
                b2b["R"], b2b["WM"], b2b["sh"],
                b2c["R"], b2c["WM"], b2c["sh"],
                mp["csel"], mp["rsel"])

    def _const_spec(a):
        nd = a.ndim
        return pl.BlockSpec(tuple(a.shape), lambda n: (0,) * nd)

    in_specs = [pl.BlockSpec((None, H, W * Cin), lambda n: (n, 0, 0))]
    in_specs += [_const_spec(a) for a in operands[1:]]

    slab = pl.pallas_call(
        kernel,
        out_shape=jax.ShapeDtypeStruct((N, Ho, out_lanes), jnp.float32),
        grid=(N,),
        in_specs=in_specs,
        out_specs=pl.BlockSpec((None, Ho, out_lanes), lambda n: (n, 0, 0)),
        compiler_params=pltpu.CompilerParams(
            dimension_semantics=("parallel",)),
    )(*operands)

    c1 = int(p1["w"].shape[-1])
    c2c = int(p2c["w"].shape[-1])
    o2 = b1["width_p"]
    o3 = o2 + b2c["width_p"]
    y1 = slab[:, :, 0:b1["width"]].reshape(N, Ho, Wo, c1)
    y2 = slab[:, :, o2:o2 + b2c["width"]].reshape(N, Ho, b2c["Wo"], c2c)
    y3 = slab[:, :, o3:o3 + mp["width"]].reshape(N, Ho, mp["Wo"], Cin)
    out = jnp.concatenate([y1, y2, y3], axis=-1)      # NHWC channel concat
    return jnp.transpose(out, (0, 3, 1, 2))           # -> NCHW


# ----------------------------------------------------------------------------
# Parameter construction (deterministic, synthetic; BN in inference form)
# ----------------------------------------------------------------------------
def make_conv_params(key, cin, cout, k, eps=1e-5):
    kw_key, g_key, b_key = jax.random.split(key, 3)
    w = 0.1 * jax.random.normal(kw_key, (k, k, cin, cout), dtype=jnp.float32)
    gamma = 1.0 + 0.1 * jax.random.normal(g_key, (cout,), dtype=jnp.float32)
    beta = 0.1 * jax.random.normal(b_key, (cout,), dtype=jnp.float32)
    running_mean = jnp.zeros((cout,), jnp.float32)
    running_var = jnp.ones((cout,), jnp.float32)
    scale = gamma / jnp.sqrt(running_var + eps)
    shift = beta - running_mean * scale
    return {"w": w, "scale": scale, "shift": shift}


def make_reduction_a_params(key, in_channels, c3x3_out, c5x5_in, c5x5_out):
    k1, k2, k3, k4 = jax.random.split(key, 4)
    return {
        "b1": make_conv_params(k1, in_channels, c3x3_out, 3),
        "b2a": make_conv_params(k2, in_channels, c5x5_in, 1),
        "b2b": make_conv_params(k3, c5x5_in, c5x5_out, 3),
        "b2c": make_conv_params(k4, c5x5_out, c5x5_out, 3),
    }


if __name__ == "__main__":
    N, Cin, H, W = 2, 4, 16, 16
    c3x3_out, c5x5_in, c5x5_out = 8, 6, 8

    key = jax.random.PRNGKey(0)
    x_key, p_key = jax.random.split(key)
    x = jax.random.normal(x_key, (N, Cin, H, W), dtype=jnp.float32)
    params = make_reduction_a_params(p_key, Cin, c3x3_out, c5x5_in, c5x5_out)

    out = jax.jit(reduction_a_forward)(x, params)
    out = jax.block_until_ready(out)

    expected_c = c3x3_out + c5x5_out + Cin           # 8 + 8 + 4 = 20
    expected_hw = (H - 3) // 2 + 1                   # 7
    assert out.shape == (N, expected_c, expected_hw, expected_hw), out.shape
    assert bool(jnp.all(jnp.isfinite(out)))
    print("KERNEL_OK")
</pallas_src>

<mosaic_0001>
module attributes {stable_mosaic.version = 11 : i64} {
  func.func @kernel(%arg0: i32, %arg1: memref<1x16x64xf32, #tpu.memory_space<vmem>>, %arg2: memref<3x7x16xbf16, #tpu.memory_space<vmem>>, %arg3: memref<3x64x128xbf16, #tpu.memory_space<vmem>>, %arg4: memref<1x128xf32, #tpu.memory_space<vmem>>, %arg5: memref<64x96xbf16, #tpu.memory_space<vmem>>, %arg6: memref<1x96xf32, #tpu.memory_space<vmem>>, %arg7: memref<3x16x16xbf16, #tpu.memory_space<vmem>>, %arg8: memref<3x96x128xbf16, #tpu.memory_space<vmem>>, %arg9: memref<1x128xf32, #tpu.memory_space<vmem>>, %arg10: memref<3x7x16xbf16, #tpu.memory_space<vmem>>, %arg11: memref<3x128x128xbf16, #tpu.memory_space<vmem>>, %arg12: memref<1x128xf32, #tpu.memory_space<vmem>>, %arg13: memref<52x128xf32, #tpu.memory_space<vmem>>, %arg14: memref<7x13xf32, #tpu.memory_space<vmem>>, %arg15: memref<1x7x384xf32, #tpu.memory_space<vmem>>) attributes {dimension_semantics = [#tpu.dimension_semantics<parallel>], iteration_bounds = array<i64: 2>, scalar_prefetch = 0 : i64, scratch_operands = 0 : i64, tpu.core_type = #tpu.core_type<tc>, window_params = [{transform_indices = @transform_0, window_bounds = array<i64: 1, 16, 64>}, {pipeline_mode = #tpu.pipeline_mode<synchronous>, transform_indices = @transform_1, window_bounds = array<i64: 3, 7, 16>}, {pipeline_mode = #tpu.pipeline_mode<synchronous>, transform_indices = @transform_2, window_bounds = array<i64: 3, 64, 128>}, {pipeline_mode = #tpu.pipeline_mode<synchronous>, transform_indices = @transform_3, window_bounds = array<i64: 1, 128>}, {pipeline_mode = #tpu.pipeline_mode<synchronous>, transform_indices = @transform_4, window_bounds = array<i64: 64, 96>}, {pipeline_mode = #tpu.pipeline_mode<synchronous>, transform_indices = @transform_5, window_bounds = array<i64: 1, 96>}, {pipeline_mode = #tpu.pipeline_mode<synchronous>, transform_indices = @transform_6, window_bounds = array<i64: 3, 16, 16>}, {pipeline_mode = #tpu.pipeline_mode<synchronous>, transform_indices = @transform_7, window_bounds = array<i64: 3, 96, 128>}, {pipeline_mode = #tpu.pipeline_mode<synchronous>, transform_indices = @transform_8, window_bounds = array<i64: 1, 128>}, {pipeline_mode = #tpu.pipeline_mode<synchronous>, transform_indices = @transform_9, window_bounds = array<i64: 3, 7, 16>}, {pipeline_mode = #tpu.pipeline_mode<synchronous>, transform_indices = @transform_10, window_bounds = array<i64: 3, 128, 128>}, {pipeline_mode = #tpu.pipeline_mode<synchronous>, transform_indices = @transform_11, window_bounds = array<i64: 1, 128>}, {pipeline_mode = #tpu.pipeline_mode<synchronous>, transform_indices = @transform_12, window_bounds = array<i64: 52, 128>}, {pipeline_mode = #tpu.pipeline_mode<synchronous>, transform_indices = @transform_13, window_bounds = array<i64: 7, 13>}, {transform_indices = @transform_14, window_bounds = array<i64: 1, 7, 384>}]} {
    %c0 = arith.constant 0 : index
    %c0_0 = arith.constant 0 : index
    %c0_1 = arith.constant 0 : index
    %0 = vector.load %arg1[%c0, %c0_0, %c0_1] : memref<1x16x64xf32, #tpu.memory_space<vmem>>, vector<1x16x64xf32>
    %1 = vector.shape_cast %0 : vector<1x16x64xf32> to vector<16x64xf32>
    %2 = arith.truncf %1 : vector<16x64xf32> to vector<16x64xbf16>
    %c0_2 = arith.constant 0 : index
    %c0_3 = arith.constant 0 : index
    %c0_4 = arith.constant 0 : index
    %3 = vector.load %arg2[%c0_2, %c0_3, %c0_4] : memref<3x7x16xbf16, #tpu.memory_space<vmem>>, vector<1x7x16xbf16>
    %4 = vector.shape_cast %3 : vector<1x7x16xbf16> to vector<7x16xbf16>
    %cst = arith.constant dense<0.000000e+00> : vector<7x64xf32>
    %5 = tpu.matmul %4, %2, %cst {dimension_numbers = #tpu.dot_dimension_numbers<[1], [0], [0], [1], [0, 0, 1, 1], [], []>} : vector<7x16xbf16>, vector<16x64xbf16>, vector<7x64xf32> -> vector<7x64xf32>
    %6 = arith.truncf %5 : vector<7x64xf32> to vector<7x64xbf16>
    %c0_5 = arith.constant 0 : index
    %c0_6 = arith.constant 0 : index
    %c0_7 = arith.constant 0 : index
    %7 = vector.load %arg3[%c0_5, %c0_6, %c0_7] : memref<3x64x128xbf16, #tpu.memory_space<vmem>>, vector<1x64x128xbf16>
    %8 = vector.shape_cast %7 : vector<1x64x128xbf16> to vector<64x128xbf16>
    %cst_8 = arith.constant dense<0.000000e+00> : vector<7x128xf32>
    %9 = tpu.matmul %6, %8, %cst_8 {dimension_numbers = #tpu.dot_dimension_numbers<[1], [0], [0], [1], [0, 0, 1, 1], [], []>} : vector<7x64xbf16>, vector<64x128xbf16>, vector<7x128xf32> -> vector<7x128xf32>
    %c1 = arith.constant 1 : index
    %c0_9 = arith.constant 0 : index
    %c0_10 = arith.constant 0 : index
    %10 = vector.load %arg2[%c1, %c0_9, %c0_10] : memref<3x7x16xbf16, #tpu.memory_space<vmem>>, vector<1x7x16xbf16>
    %11 = vector.shape_cast %10 : vector<1x7x16xbf16> to vector<7x16xbf16>
    %cst_11 = arith.constant dense<0.000000e+00> : vector<7x64xf32>
    %12 = tpu.matmul %11, %2, %cst_11 {dimension_numbers = #tpu.dot_dimension_numbers<[1], [0], [0], [1], [0, 0, 1, 1], [], []>} : vector<7x16xbf16>, vector<16x64xbf16>, vector<7x64xf32> -> vector<7x64xf32>
    %13 = arith.truncf %12 : vector<7x64xf32> to vector<7x64xbf16>
    %c1_12 = arith.constant 1 : index
    %c0_13 = arith.constant 0 : index
    %c0_14 = arith.constant 0 : index
    %14 = vector.load %arg3[%c1_12, %c0_13, %c0_14] : memref<3x64x128xbf16, #tpu.memory_space<vmem>>, vector<1x64x128xbf16>
    %15 = vector.shape_cast %14 : vector<1x64x128xbf16> to vector<64x128xbf16>
    %cst_15 = arith.constant dense<0.000000e+00> : vector<7x128xf32>
    %16 = tpu.matmul %13, %15, %cst_15 {dimension_numbers = #tpu.dot_dimension_numbers<[1], [0], [0], [1], [0, 0, 1, 1], [], []>} : vector<7x64xbf16>, vector<64x128xbf16>, vector<7x128xf32> -> vector<7x128xf32>
    %17 = arith.addf %9, %16 : vector<7x128xf32>
    %c2 = arith.constant 2 : index
    %c0_16 = arith.constant 0 : index
    %c0_17 = arith.constant 0 : index
    %18 = vector.load %arg2[%c2, %c0_16, %c0_17] : memref<3x7x16xbf16, #tpu.memory_space<vmem>>, vector<1x7x16xbf16>
    %19 = vector.shape_cast %18 : vector<1x7x16xbf16> to vector<7x16xbf16>
    %cst_18 = arith.constant dense<0.000000e+00> : vector<7x64xf32>
    %20 = tpu.matmul %19, %2, %cst_18 {dimension_numbers = #tpu.dot_dimension_numbers<[1], [0], [0], [1], [0, 0, 1, 1], [], []>} : vector<7x16xbf16>, vector<16x64xbf16>, vector<7x64xf32> -> vector<7x64xf32>
    %21 = arith.truncf %20 : vector<7x64xf32> to vector<7x64xbf16>
    %c2_19 = arith.constant 2 : index
    %c0_20 = arith.constant 0 : index
    %c0_21 = arith.constant 0 : index
    %22 = vector.load %arg3[%c2_19, %c0_20, %c0_21] : memref<3x64x128xbf16, #tpu.memory_space<vmem>>, vector<1x64x128xbf16>
    %23 = vector.shape_cast %22 : vector<1x64x128xbf16> to vector<64x128xbf16>
    %cst_22 = arith.constant dense<0.000000e+00> : vector<7x128xf32>
    %24 = tpu.matmul %21, %23, %cst_22 {dimension_numbers = #tpu.dot_dimension_numbers<[1], [0], [0], [1], [0, 0, 1, 1], [], []>} : vector<7x64xbf16>, vector<64x128xbf16>, vector<7x128xf32> -> vector<7x128xf32>
    %25 = arith.addf %17, %24 : vector<7x128xf32>
    %c0_23 = arith.constant 0 : index
    %c0_24 = arith.constant 0 : index
    %26 = vector.load %arg4[%c0_23, %c0_24] : memref<1x128xf32, #tpu.memory_space<vmem>>, vector<1x128xf32>
    %27 = vector.broadcast %26 : vector<1x128xf32> to vector<7x128xf32>
    %28 = arith.addf %25, %27 : vector<7x128xf32>
    %cst_25 = arith.constant 0.000000e+00 : f32
    %29 = vector.broadcast %cst_25 : f32 to vector<7x128xf32>
    %30 = arith.maximumf %28, %29 : vector<7x128xf32>
    %c0_26 = arith.constant 0 : index
    %c0_27 = arith.constant 0 : index
    %31 = vector.load %arg5[%c0_26, %c0_27] : memref<64x96xbf16, #tpu.memory_space<vmem>>, vector<64x96xbf16>
    %cst_28 = arith.constant dense<0.000000e+00> : vector<16x96xf32>
    %32 = tpu.matmul %2, %31, %cst_28 {dimension_numbers = #tpu.dot_dimension_numbers<[1], [0], [0], [1], [0, 0, 1, 1], [], []>} : vector<16x64xbf16>, vector<64x96xbf16>, vector<16x96xf32> -> vector<16x96xf32>
    %c0_29 = arith.constant 0 : index
    %c0_30 = arith.constant 0 : index
    %33 = vector.load %arg6[%c0_29, %c0_30] : memref<1x96xf32, #tpu.memory_space<vmem>>, vector<1x96xf32>
    %34 = vector.broadcast %33 : vector<1x96xf32> to vector<16x96xf32>
    %35 = arith.addf %32, %34 : vector<16x96xf32>
    %cst_31 = arith.constant 0.000000e+00 : f32
    %36 = vector.broadcast %cst_31 : f32 to vector<16x96xf32>
    %37 = arith.maximumf %35, %36 : vector<16x96xf32>
    %38 = arith.truncf %37 : vector<16x96xf32> to vector<16x96xbf16>
    %c0_32 = arith.constant 0 : index
    %c0_33 = arith.constant 0 : index
    %c0_34 = arith.constant 0 : index
    %39 = vector.load %arg7[%c0_32, %c0_33, %c0_34] : memref<3x16x16xbf16, #tpu.memory_space<vmem>>, vector<1x16x16xbf16>
    %40 = vector.shape_cast %39 : vector<1x16x16xbf16> to vector<16x16xbf16>
    %cst_35 = arith.constant dense<0.000000e+00> : vector<16x96xf32>
    %41 = tpu.matmul %40, %38, %cst_35 {dimension_numbers = #tpu.dot_dimension_numbers<[1], [0], [0], [1], [0, 0, 1, 1], [], []>} : vector<16x16xbf16>, vector<16x96xbf16>, vector<16x96xf32> -> vector<16x96xf32>
    %42 = arith.truncf %41 : vector<16x96xf32> to vector<16x96xbf16>
    %c0_36 = arith.constant 0 : index
    %c0_37 = arith.constant 0 : index
    %c0_38 = arith.constant 0 : index
    %43 = vector.load %arg8[%c0_36, %c0_37, %c0_38] : memref<3x96x128xbf16, #tpu.memory_space<vmem>>, vector<1x96x128xbf16>
    %44 = vector.shape_cast %43 : vector<1x96x128xbf16> to vector<96x128xbf16>
    %cst_39 = arith.constant dense<0.000000e+00> : vector<16x128xf32>
    %45 = tpu.matmul %42, %44, %cst_39 {dimension_numbers = #tpu.dot_dimension_numbers<[1], [0], [0], [1], [0, 0, 1, 1], [], []>} : vector<16x96xbf16>, vector<96x128xbf16>, vector<16x128xf32> -> vector<16x128xf32>
    %c1_40 = arith.constant 1 : index
    %c0_41 = arith.constant 0 : index
    %c0_42 = arith.constant 0 : index
    %46 = vector.load %arg7[%c1_40, %c0_41, %c0_42] : memref<3x16x16xbf16, #tpu.memory_space<vmem>>, vector<1x16x16xbf16>
    %47 = vector.shape_cast %46 : vector<1x16x16xbf16> to vector<16x16xbf16>
    %cst_43 = arith.constant dense<0.000000e+00> : vector<16x96xf32>
    %48 = tpu.matmul %47, %38, %cst_43 {dimension_numbers = #tpu.dot_dimension_numbers<[1], [0], [0], [1], [0, 0, 1, 1], [], []>} : vector<16x16xbf16>, vector<16x96xbf16>, vector<16x96xf32> -> vector<16x96xf32>
    %49 = arith.truncf %48 : vector<16x96xf32> to vector<16x96xbf16>
    %c1_44 = arith.constant 1 : index
    %c0_45 = arith.constant 0 : index
    %c0_46 = arith.constant 0 : index
    %50 = vector.load %arg8[%c1_44, %c0_45, %c0_46] : memref<3x96x128xbf16, #tpu.memory_space<vmem>>, vector<1x96x128xbf16>
    %51 = vector.shape_cast %50 : vector<1x96x128xbf16> to vector<96x128xbf16>
    %cst_47 = arith.constant dense<0.000000e+00> : vector<16x128xf32>
    %52 = tpu.matmul %49, %51, %cst_47 {dimension_numbers = #tpu.dot_dimension_numbers<[1], [0], [0], [1], [0, 0, 1, 1], [], []>} : vector<16x96xbf16>, vector<96x128xbf16>, vector<16x128xf32> -> vector<16x128xf32>
    %53 = arith.addf %45, %52 : vector<16x128xf32>
    %c2_48 = arith.constant 2 : index
    %c0_49 = arith.constant 0 : index
    %c0_50 = arith.constant 0 : index
    %54 = vector.load %arg7[%c2_48, %c0_49, %c0_50] : memref<3x16x16xbf16, #tpu.memory_space<vmem>>, vector<1x16x16xbf16>
    %55 = vector.shape_cast %54 : vector<1x16x16xbf16> to vector<16x16xbf16>
    %cst_51 = arith.constant dense<0.000000e+00> : vector<16x96xf32>
    %56 = tpu.matmul %55, %38, %cst_51 {dimension_numbers = #tpu.dot_dimension_numbers<[1], [0], [0], [1], [0, 0, 1, 1], [], []>} : vector<16x16xbf16>, vector<16x96xbf16>, vector<16x96xf32> -> vector<16x96xf32>
    %57 = arith.truncf %56 : vector<16x96xf32> to vector<16x96xbf16>
    %c2_52 = arith.constant 2 : index
    %c0_53 = arith.constant 0 : index
    %c0_54 = arith.constant 0 : index
    %58 = vector.load %arg8[%c2_52, %c0_53, %c0_54] : memref<3x96x128xbf16, #tpu.memory_space<vmem>>, vector<1x96x128xbf16>
    %59 = vector.shape_cast %58 : vector<1x96x128xbf16> to vector<96x128xbf16>
    %cst_55 = arith.constant dense<0.000000e+00> : vector<16x128xf32>
    %60 = tpu.matmul %57, %59, %cst_55 {dimension_numbers = #tpu.dot_dimension_numbers<[1], [0], [0], [1], [0, 0, 1, 1], [], []>} : vector<16x96xbf16>, vector<96x128xbf16>, vector<16x128xf32> -> vector<16x128xf32>
    %61 = arith.addf %53, %60 : vector<16x128xf32>
    %c0_56 = arith.constant 0 : index
    %c0_57 = arith.constant 0 : index
    %62 = vector.load %arg9[%c0_56, %c0_57] : memref<1x128xf32, #tpu.memory_space<vmem>>, vector<1x128xf32>
    %63 = vector.broadcast %62 : vector<1x128xf32> to vector<16x128xf32>
    %64 = arith.addf %61, %63 : vector<16x128xf32>
    %cst_58 = arith.constant 0.000000e+00 : f32
    %65 = vector.broadcast %cst_58 : f32 to vector<16x128xf32>
    %66 = arith.maximumf %64, %65 : vector<16x128xf32>
    %67 = arith.truncf %66 : vector<16x128xf32> to vector<16x128xbf16>
    %c0_59 = arith.constant 0 : index
    %c0_60 = arith.constant 0 : index
    %c0_61 = arith.constant 0 : index
    %68 = vector.load %arg10[%c0_59, %c0_60, %c0_61] : memref<3x7x16xbf16, #tpu.memory_space<vmem>>, vector<1x7x16xbf16>
    %69 = vector.shape_cast %68 : vector<1x7x16xbf16> to vector<7x16xbf16>
    %cst_62 = arith.constant dense<0.000000e+00> : vector<7x128xf32>
    %70 = tpu.matmul %69, %67, %cst_62 {dimension_numbers = #tpu.dot_dimension_numbers<[1], [0], [0], [1], [0, 0, 1, 1], [], []>} : vector<7x16xbf16>, vector<16x128xbf16>, vector<7x128xf32> -> vector<7x128xf32>
    %71 = arith.truncf %70 : vector<7x128xf32> to vector<7x128xbf16>
    %c0_63 = arith.constant 0 : index
    %c0_64 = arith.constant 0 : index
    %c0_65 = arith.constant 0 : index
    %72 = vector.load %arg11[%c0_63, %c0_64, %c0_65] : memref<3x128x128xbf16, #tpu.memory_space<vmem>>, vector<1x128x128xbf16>
    %73 = vector.shape_cast %72 : vector<1x128x128xbf16> to vector<128x128xbf16>
    %cst_66 = arith.constant dense<0.000000e+00> : vector<7x128xf32>
    %74 = tpu.matmul %71, %73, %cst_66 {dimension_numbers = #tpu.dot_dimension_numbers<[1], [0], [0], [1], [0, 0, 1, 1], [], []>} : vector<7x128xbf16>, vector<128x128xbf16>, vector<7x128xf32> -> vector<7x128xf32>
    %c1_67 = arith.constant 1 : index
    %c0_68 = arith.constant 0 : index
    %c0_69 = arith.constant 0 : index
    %75 = vector.load %arg10[%c1_67, %c0_68, %c0_69] : memref<3x7x16xbf16, #tpu.memory_space<vmem>>, vector<1x7x16xbf16>
    %76 = vector.shape_cast %75 : vector<1x7x16xbf16> to vector<7x16xbf16>
    %cst_70 = arith.constant dense<0.000000e+00> : vector<7x128xf32>
    %77 = tpu.matmul %76, %67, %cst_70 {dimension_numbers = #tpu.dot_dimension_numbers<[1], [0], [0], [1], [0, 0, 1, 1], [], []>} : vector<7x16xbf16>, vector<16x128xbf16>, vector<7x128xf32> -> vector<7x128xf32>
    %78 = arith.truncf %77 : vector<7x128xf32> to vector<7x128xbf16>
    %c1_71 = arith.constant 1 : index
    %c0_72 = arith.constant 0 : index
    %c0_73 = arith.constant 0 : index
    %79 = vector.load %arg11[%c1_71, %c0_72, %c0_73] : memref<3x128x128xbf16, #tpu.memory_space<vmem>>, vector<1x128x128xbf16>
    %80 = vector.shape_cast %79 : vector<1x128x128xbf16> to vector<128x128xbf16>
    %cst_74 = arith.constant dense<0.000000e+00> : vector<7x128xf32>
    %81 = tpu.matmul %78, %80, %cst_74 {dimension_numbers = #tpu.dot_dimension_numbers<[1], [0], [0], [1], [0, 0, 1, 1], [], []>} : vector<7x128xbf16>, vector<128x128xbf16>, vector<7x128xf32> -> vector<7x128xf32>
    %82 = arith.addf %74, %81 : vector<7x128xf32>
    %c2_75 = arith.constant 2 : index
    %c0_76 = arith.constant 0 : index
    %c0_77 = arith.constant 0 : index
    %83 = vector.load %arg10[%c2_75, %c0_76, %c0_77] : memref<3x7x16xbf16, #tpu.memory_space<vmem>>, vector<1x7x16xbf16>
    %84 = vector.shape_cast %83 : vector<1x7x16xbf16> to vector<7x16xbf16>
    %cst_78 = arith.constant dense<0.000000e+00> : vector<7x128xf32>
    %85 = tpu.matmul %84, %67, %cst_78 {dimension_numbers = #tpu.dot_dimension_numbers<[1], [0], [0], [1], [0, 0, 1, 1], [], []>} : vector<7x16xbf16>, vector<16x128xbf16>, vector<7x128xf32> -> vector<7x128xf32>
    %86 = arith.truncf %85 : vector<7x128xf32> to vector<7x128xbf16>
    %c2_79 = arith.constant 2 : index
    %c0_80 = arith.constant 0 : index
    %c0_81 = arith.constant 0 : index
    %87 = vector.load %arg11[%c2_79, %c0_80, %c0_81] : memref<3x128x128xbf16, #tpu.memory_space<vmem>>, vector<1x128x128xbf16>
    %88 = vector.shape_cast %87 : vector<1x128x128xbf16> to vector<128x128xbf16>
    %cst_82 = arith.constant dense<0.000000e+00> : vector<7x128xf32>
    %89 = tpu.matmul %86, %88, %cst_82 {dimension_numbers = #tpu.dot_dimension_numbers<[1], [0], [0], [1], [0, 0, 1, 1], [], []>} : vector<7x128xbf16>, vector<128x128xbf16>, vector<7x128xf32> -> vector<7x128xf32>
    %90 = arith.addf %82, %89 : vector<7x128xf32>
    %c0_83 = arith.constant 0 : index
    %c0_84 = arith.constant 0 : index
    %91 = vector.load %arg12[%c0_83, %c0_84] : memref<1x128xf32, #tpu.memory_space<vmem>>, vector<1x128xf32>
    %92 = vector.broadcast %91 : vector<1x128xf32> to vector<7x128xf32>
    %93 = arith.addf %90, %92 : vector<7x128xf32>
    %cst_85 = arith.constant 0.000000e+00 : f32
    %94 = vector.broadcast %cst_85 : f32 to vector<7x128xf32>
    %95 = arith.maximumf %93, %94 : vector<7x128xf32>
    %96 = vector.extract_strided_slice %1 {offsets = [0, 0], sizes = [16, 52], strides = [1, 1]} : vector<16x64xf32> to vector<16x52xf32>
    %97 = vector.extract_strided_slice %1 {offsets = [0, 4], sizes = [16, 52], strides = [1, 1]} : vector<16x64xf32> to vector<16x52xf32>
    %98 = arith.maximumf %96, %97 : vector<16x52xf32>
    %99 = vector.extract_strided_slice %1 {offsets = [0, 8], sizes = [16, 52], strides = [1, 1]} : vector<16x64xf32> to vector<16x52xf32>
    %100 = arith.maximumf %98, %99 : vector<16x52xf32>
    %c0_86 = arith.constant 0 : index
    %c0_87 = arith.constant 0 : index
    %101 = vector.load %arg13[%c0_86, %c0_87] : memref<52x128xf32, #tpu.memory_space<vmem>>, vector<52x128xf32>
    %cst_88 = arith.constant dense<0.000000e+00> : vector<16x128xf32>
    %102 = tpu.matmul %100, %101, %cst_88 {dimension_numbers = #tpu.dot_dimension_numbers<[1], [0], [0], [1], [0, 0, 1, 1], [], []>} : vector<16x52xf32>, vector<52x128xf32>, vector<16x128xf32> -> vector<16x128xf32>
    %103 = vector.extract_strided_slice %102 {offsets = [0, 0], sizes = [13, 128], strides = [1, 1]} : vector<16x128xf32> to vector<13x128xf32>
    %104 = vector.extract_strided_slice %102 {offsets = [1, 0], sizes = [13, 128], strides = [1, 1]} : vector<16x128xf32> to vector<13x128xf32>
    %105 = arith.maximumf %103, %104 : vector<13x128xf32>
    %106 = vector.extract_strided_slice %102 {offsets = [2, 0], sizes = [13, 128], strides = [1, 1]} : vector<16x128xf32> to vector<13x128xf32>
    %107 = arith.maximumf %105, %106 : vector<13x128xf32>
    %c0_89 = arith.constant 0 : index
    %c0_90 = arith.constant 0 : index
    %108 = vector.load %arg14[%c0_89, %c0_90] : memref<7x13xf32, #tpu.memory_space<vmem>>, vector<7x13xf32>
    %cst_91 = arith.constant dense<0.000000e+00> : vector<7x128xf32>
    %109 = tpu.matmul %108, %107, %cst_91 {dimension_numbers = #tpu.dot_dimension_numbers<[1], [0], [0], [1], [0, 0, 1, 1], [], []>} : vector<7x13xf32>, vector<13x128xf32>, vector<7x128xf32> -> vector<7x128xf32>
    %110 = tpu.concatenate %30, %95, %109 in 1 : vector<7x128xf32>, vector<7x128xf32>, vector<7x128xf32> -> vector<7x384xf32>
    %c0_92 = arith.constant 0 : index
    %c0_93 = arith.constant 0 : index
    %c0_94 = arith.constant 0 : index
    %111 = vector.load %arg15[%c0_92, %c0_93, %c0_94] : memref<1x7x384xf32, #tpu.memory_space<vmem>>, vector<1x7x384xf32>
    %112 = vector.shape_cast %111 : vector<1x7x384xf32> to vector<7x384xf32>
    %113 = vector.shape_cast %110 : vector<7x384xf32> to vector<1x7x384xf32>
    tpu.vector_store %arg15[%c0_92, %c0_93, %c0_94], %113 {strides = array<i32>} : memref<1x7x384xf32, #tpu.memory_space<vmem>>, vector<1x7x384xf32>,
    return
  }
  func.func @transform_0(%arg0: i32) -> (i32, i32, i32) {
    %c0_i32 = arith.constant 0 : i32
    %c0_i32_0 = arith.constant 0 : i32
    %c0_i32_1 = arith.constant 0 : i32
    return %arg0, %c0_i32, %c0_i32_0 : i32, i32, i32
  }
  func.func @transform_1(%arg0: i32) -> (i32, i32, i32) {
    %c0_i32 = arith.constant 0 : i32
    %c0_i32_0 = arith.constant 0 : i32
    %c0_i32_1 = arith.constant 0 : i32
    %c0_i32_2 = arith.constant 0 : i32
    return %c0_i32, %c0_i32_0, %c0_i32_1 : i32, i32, i32
  }
  func.func @transform_2(%arg0: i32) -> (i32, i32, i32) {
    %c0_i32 = arith.constant 0 : i32
    %c0_i32_0 = arith.constant 0 : i32
    %c0_i32_1 = arith.constant 0 : i32
    %c0_i32_2 = arith.constant 0 : i32
    return %c0_i32, %c0_i32_0, %c0_i32_1 : i32, i32, i32
  }
  func.func @transform_3(%arg0: i32) -> (i32, i32) {
    %c0_i32 = arith.constant 0 : i32
    %c0_i32_0 = arith.constant 0 : i32
    %c0_i32_1 = arith.constant 0 : i32
    return %c0_i32, %c0_i32_0 : i32, i32
  }
  func.func @transform_4(%arg0: i32) -> (i32, i32) {
    %c0_i32 = arith.constant 0 : i32
    %c0_i32_0 = arith.constant 0 : i32
    %c0_i32_1 = arith.constant 0 : i32
    return %c0_i32, %c0_i32_0 : i32, i32
  }
  func.func @transform_5(%arg0: i32) -> (i32, i32) {
    %c0_i32 = arith.constant 0 : i32
    %c0_i32_0 = arith.constant 0 : i32
    %c0_i32_1 = arith.constant 0 : i32
    return %c0_i32, %c0_i32_0 : i32, i32
  }
  func.func @transform_6(%arg0: i32) -> (i32, i32, i32) {
    %c0_i32 = arith.constant 0 : i32
    %c0_i32_0 = arith.constant 0 : i32
    %c0_i32_1 = arith.constant 0 : i32
    %c0_i32_2 = arith.constant 0 : i32
    return %c0_i32, %c0_i32_0, %c0_i32_1 : i32, i32, i32
  }
  func.func @transform_7(%arg0: i32) -> (i32, i32, i32) {
    %c0_i32 = arith.constant 0 : i32
    %c0_i32_0 = arith.constant 0 : i32
    %c0_i32_1 = arith.constant 0 : i32
    %c0_i32_2 = arith.constant 0 : i32
    return %c0_i32, %c0_i32_0, %c0_i32_1 : i32, i32, i32
  }
  func.func @transform_8(%arg0: i32) -> (i32, i32) {
    %c0_i32 = arith.constant 0 : i32
    %c0_i32_0 = arith.constant 0 : i32
    %c0_i32_1 = arith.constant 0 : i32
    return %c0_i32, %c0_i32_0 : i32, i32
  }
  func.func @transform_9(%arg0: i32) -> (i32, i32, i32) {
    %c0_i32 = arith.constant 0 : i32
    %c0_i32_0 = arith.constant 0 : i32
    %c0_i32_1 = arith.constant 0 : i32
    %c0_i32_2 = arith.constant 0 : i32
    return %c0_i32, %c0_i32_0, %c0_i32_1 : i32, i32, i32
  }
  func.func @transform_10(%arg0: i32) -> (i32, i32, i32) {
    %c0_i32 = arith.constant 0 : i32
    %c0_i32_0 = arith.constant 0 : i32
    %c0_i32_1 = arith.constant 0 : i32
    %c0_i32_2 = arith.constant 0 : i32
    return %c0_i32, %c0_i32_0, %c0_i32_1 : i32, i32, i32
  }
  func.func @transform_11(%arg0: i32) -> (i32, i32) {
    %c0_i32 = arith.constant 0 : i32
    %c0_i32_0 = arith.constant 0 : i32
    %c0_i32_1 = arith.constant 0 : i32
    return %c0_i32, %c0_i32_0 : i32, i32
  }
  func.func @transform_12(%arg0: i32) -> (i32, i32) {
    %c0_i32 = arith.constant 0 : i32
    %c0_i32_0 = arith.constant 0 : i32
    %c0_i32_1 = arith.constant 0 : i32
    return %c0_i32, %c0_i32_0 : i32, i32
  }
  func.func @transform_13(%arg0: i32) -> (i32, i32) {
    %c0_i32 = arith.constant 0 : i32
    %c0_i32_0 = arith.constant 0 : i32
    %c0_i32_1 = arith.constant 0 : i32
    return %c0_i32, %c0_i32_0 : i32, i32
  }
  func.func @transform_14(%arg0: i32) -> (i32, i32, i32) {
    %c0_i32 = arith.constant 0 : i32
    %c0_i32_0 = arith.constant 0 : i32
    %c0_i32_1 = arith.constant 0 : i32
    return %arg0, %c0_i32, %c0_i32_0 : i32, i32, i32
  }
}

</mosaic_0001>

<bundles_post_ra>
// kernel: tile.24
= control target key start
LH: loop header
LB: loop body
LE: loop exit
PB: predicated region body
PF: predicated region fallthrough
CT: control target
= control target key end

     0   :  { %s61_s10 = smov 48   ;;  %s62_s11 = smov 32   ;;  %vm3_vm0 = vcmask 64512   ;;  %vm9_vm1 = vcmask 458112   ;;  %vm15_vm2 = vcmask 392512   ;;  %vm21_vm3 = vcmask 326912   ;;  %s101_s0 = inlined_call_operand.vmem [shape: f32[7,8], index: 0, kind: input, shape index: {}]   ;;  %s102_s1 = inlined_call_operand.vmem [shape: f32[56], index: 1, kind: output, shape index: {}]  }
   0x1   :  { %v49_v0 = vld [vmem:[%s101_s0 + $0x6] sm:$0x1]   ;;  %v51_v1 = vld [vmem:[%s101_s0 + $0x4] sm:$0x1]   ;;  %v50_v2 = vld [vmem:[%s101_s0 + $0x5] sm:$0x1]  }
   0x2   :  { %7 = vrot.lane.b32.xlu0 %v49_v0, %s61_s10  ;;  %19 = vrot.lane.b32.xlu1 %v51_v1, %s62_s11  ;;  %v52_v3 = vld [vmem:[%s101_s0 + $0x3] sm:$0x1]   ;;  %v2_v4 = vld [vmem:[%s101_s0] sm:$0x1]   ;;  %s63_s18 = smov 40   ;;  %s64_s19 = smov 24  }
   0x3   :  { %4 = vst.msk [vmem:[#allocation0] sm:$0x1] %vm3_vm0, %v2_v4   ;;  %v53_v5 = vld [vmem:[%s101_s0 + $0x2] sm:$0x1]   ;;  %v54_v6 = vld [vmem:[%s101_s0 + $0x1] sm:$0x1]  }
   0x4   :  { %s65_s0 = smov 16   ;;  %s66_s24 = smov 8   ;;  %vm27_vm4 = vcmask 261312   ;;  %vm33_vm5 = vcmask 195712   ;;  %vm39_vm6 = vcmask 130112  }
   0x6   :  { %13 = vrot.lane.b32.xlu0 %v50_v2, %s63_s18  ;;  %25 = vrot.lane.b32.xlu1 %v52_v3, %s64_s19 }
   0xa   :  { %31 = vrot.lane.b32.xlu0 %v53_v5, %s65_s0  ;;  %37 = vrot.lane.b32.xlu1 %v54_v6, %s66_s24 }
  0x74   :  { %v8_v7 = vpop.permute.xlu0 %7   ;;  %v20_v8 = vpop.permute.xlu1 %19  }
  0x75   :  { %10 = vst.msk [vmem:[#allocation0] sm:$0x1] %vm9_vm1, %v8_v7  }
  0x78   :  { %v14_v9 = vpop.permute.xlu0 %13   ;;  %v26_v10 = vpop.permute.xlu1 %25  }
  0x79   :  { %16 = vst.msk [vmem:[#allocation0] sm:$0x1] %vm15_vm2, %v14_v9  }
  0x7a   :  { %22 = vst.msk [vmem:[#allocation0] sm:$0x1] %vm21_vm3, %v20_v8  }
  0x7b   :  { %28 = vst.msk [vmem:[#allocation0] sm:$0x1] %vm27_vm4, %v26_v10  }
  0x7c   :  { %v32_v11 = vpop.permute.xlu0 %31   ;;  %v38_v12 = vpop.permute.xlu1 %37  }
  0x7d   :  { %34 = vst.msk [vmem:[#allocation0] sm:$0x1] %vm33_vm5, %v32_v11  }
  0x7e   :  { %40 = vst.msk [vmem:[#allocation0] sm:$0x1] %vm39_vm6, %v38_v12  }
  0x85   :  { %v45_v13 = vld [vmem:[#allocation0] sm:$0x1] }
  0x86   :  { %48 = vst [vmem:[%s102_s1] sm:$0x1] %v45_v13 }

// kernel: tile.23
= control target key start
LH: loop header
LB: loop body
LE: loop exit
PB: predicated region body
PF: predicated region fallthrough
CT: control target
= control target key end

     0   :  { %2 = vsyncpa [#allocation1], 0  ;;  %s42_s6 = smov [#allocation0]   ;;  %s59_s0 = inlined_call_operand.hbm [shape: f32[8], index: 0, kind: input, shape index: {}]   ;;  %s60_s1 = inlined_call_operand.vmem [shape: f32[7,8], index: 1, kind: output, shape index: {}]  }
   0x1   :  { %s9_s7 = sshll.u32 %s42_s6, 4  ;;  %s10_s7 = int_to_ptr.vmem [resolvable:$true] %s9_s7 }
   0x2   :  { %s28_s8 = scalar_lea.vmem %s10_s7, 16  ;;  %s32_s9 = scalar_lea.vmem %s10_s7, 32 }
   0x3   :  { %p29_p0 = scmp.ne.s32.totalorder %s10_s7, %s28_s8  ;;  %p33_p1 = scmp.lt.s32.totalorder %s10_s7, %s10_s7 }
   0x4   :  { %p34_p2 = scmp.lt.s32.totalorder %s32_s9, %s28_s8 }
   0x6   :  { %p35_p3 = por %p34_p2, %p33_p1 }
   0x8   :  { %p36_p4 = pnand %p35_p3, %p29_p0 }
   0xa   :  { %39 = shalt.err (!%p36_p4)
}
   0xb   :  { %12 = dma.hbm_to_vmem [thread:$0]  %s59_s0, 16, %s10_s7, [#allocation1]  }
   0xc   :  { %40 = dma.done.wait [#allocation1], 16  }
   0xd   :  { %41 = vsyncadd [#allocation1], 4294967280  ;;  %v16_v0 = vld [vmem:[#allocation0] ss:$0 sm:$0xff] }
   0xe   :  { %17 = vst [vmem:[%s60_s1] sm:$0xff] %v16_v0 }
   0xf   :  { %18 = vsyncpa [#allocation1], 1 }

// kernel: tile.28
= control target key start
LH: loop header
LB: loop body
LE: loop exit
PB: predicated region body
PF: predicated region fallthrough
CT: control target
= control target key end

     0   :  { %s28_s0 = inlined_call_operand.vmem [shape: f32[6], index: 0, kind: input, shape index: {}]   ;;  %s29_s1 = inlined_call_operand.vmem [shape: f32[16,6], index: 1, kind: output, shape index: {}]  }
   0x1   :  { %v4_v0 = vld [vmem:[%s28_s0] ss:$0 sm:$0xff] }
   0x2   :  { %5 = vst [vmem:[%s29_s1] sm:$0xff] %v4_v0  ;;  %8 = vst [vmem:[%s29_s1 + $0x8] sm:$0xff] %v4_v0 }

// kernel: tile.33
= control target key start
LH: loop header
LB: loop body
LE: loop exit
PB: predicated region body
PF: predicated region fallthrough
CT: control target
= control target key end

     0   :  { %s28_s0 = inlined_call_operand.vmem [shape: f32[8], index: 0, kind: input, shape index: {}]   ;;  %s29_s1 = inlined_call_operand.vmem [shape: f32[16,8], index: 1, kind: output, shape index: {}]  }
   0x1   :  { %v4_v0 = vld [vmem:[%s28_s0] ss:$0 sm:$0xff] }
   0x2   :  { %5 = vst [vmem:[%s29_s1] sm:$0xff] %v4_v0  ;;  %8 = vst [vmem:[%s29_s1 + $0x8] sm:$0xff] %v4_v0 }

// kernel: reduction_a_forward.1
= control target key start
LH: loop header
LB: loop body
LE: loop exit
PB: predicated region body
PF: predicated region fallthrough
CT: control target
= control target key end

     0   :  { %s2782_s29 = smov 0   ;;  %s3200_s0 = inlined_call_operand.vmem [shape: f32[2,16,64], index: 0, kind: input, shape index: {}]   ;;  %s3201_s1 = inlined_call_operand.vmem [shape: bf16[3,7,16], index: 1, kind: input, shape index: {}, may-alias: {1,9}]   ;;  %s3202_s2 = inlined_call_operand.vmem [shape: bf16[3,64,128], index: 2, kind: input, shape index: {}]   ;;  %s3203_s3 = inlined_call_operand.vmem [shape: f32[1,128], index: 3, kind: input, shape index: {}]   ;;  %s3204_s4 = inlined_call_operand.vmem [shape: bf16[64,96], index: 4, kind: input, shape index: {}]   ;;  %s3205_s5 = inlined_call_operand.vmem [shape: f32[1,96], index: 5, kind: input, shape index: {}]   ;;  %s3206_s6 = inlined_call_operand.vmem [shape: bf16[3,16,16], index: 6, kind: input, shape index: {}]   ;;  %s3207_s7 = inlined_call_operand.vmem [shape: bf16[3,96,128], index: 7, kind: input, shape index: {}]   ;;  %s3208_s8 = inlined_call_operand.vmem [shape: f32[1,128], index: 8, kind: input, shape index: {}]   ;;  %s3209_s9 = inlined_call_operand.vmem [shape: bf16[3,7,16], index: 9, kind: input, shape index: {}, may-alias: {1,9}]   ;;  %s3210_s10 = inlined_call_operand.vmem [shape: bf16[3,128,128], index: 10, kind: input, shape index: {}]   ;;  %s3211_s11 = inlined_call_operand.vmem [shape: f32[1,128], index: 11, kind: input, shape index: {}]   ;;  %s3212_s12 = inlined_call_operand.vmem [shape: f32[52,128], index: 12, kind: input, shape index: {}]   ;;  %s3213_s13 = inlined_call_operand.vmem [shape: f32[7,13], index: 13, kind: input, shape index: {}]   ;;  %s3214_s14 = inlined_call_operand.vmem [shape: f32[2,7,384], index: 14, kind: output, shape index: {}]  }
   0x1 LB: > { %s2112_s30 = sadd.s32 4294967295, %s2701_s29   ;;  %p2116_p0 = scmp.ge.s32.totalorder %s2701_s29, 1  ;;  %s2701_s29 = sphi %s2782_s29, %s24_s29  }
   0x2   : > { %p412_p1 = scmp.lt.s32.totalorder %s2701_s29, 3 }
   0x4   : > { %p413_p2 = pnand %p2116_p0, %p412_p1 }
   0x5   : > { %p458_p3 = scmp.lt.s32.totalorder (!%p413_p2), %s2112_s30, 1  ;;  %s2705_s24 = smov (!%p413_p2), 124  }
   0x6   : > { %416 = sbr.rel (%p413_p2) target bundleno = 1674 (0x68a), region = 76  ;;  %s2706_s25 = smov (!%p413_p2), 120  }
   0xb   : > { %v2703_v0 = vmov 0.0   ;;  %s3216_s30 = smov (!%p458_p3, %s2112_s30), 1  ;;  %vm2704_vm0 = vmmov 0   ;;  %v472_v4 = vld [vmem:[%s3201_s1] sm:$0xf]  ;;  %v2634_v6 = vld [vmem:[%s3202_s2 + $0x38] sm:$0xff]  }
   0xc   : > { %2387 = vmatprep.subr.bf16.mxu0 %v2703_v0  ;;  %2393 = vmatprep.subr.bf16.mxu1 %v2703_v0  ;;  %s2288_s15 = sshll.u32 %s3216_s30, 4  ;;  %v2121_v5 = vld [vmem:[%s3201_s1 + $0x4] sm:$0xf]  ;;  %vm473_vm1 = vcmask 130048   ;;  %v2635_v7 = vld [vmem:[%s3202_s2 + $0x18] sm:$0xff]   ;;  %v2636_v8 = vld [vmem:[%s3202_s2 + $0x30] sm:$0xff]  }
   0xd   : > { %2389 = vmatprep.mubr.msk.bf16.mxu0 %vm2704_vm0, %v2703_v0  ;;  %2395 = vmatprep.mubr.msk.bf16.mxu1 %vm2704_vm0, %v2703_v0  ;;  %s462_s18 = scalar_lea.vmem %s3200_s0, %s2288_s15  ;;  %v2637_v9 = vld [vmem:[%s3202_s2 + $0x10] sm:$0xff]   ;;  %v2638_v10 = vld [vmem:[%s3202_s2 + $0x28] sm:$0xff]   ;;  %v2640_v12 = vld [vmem:[%s3202_s2 + $0x20] sm:$0xff]   ;;  %vm605_vm2 = vcmask 523264   ;;  %s2621_s19 = smul.u32 24, %s3216_s30  ;;  %vm1100_vm3 = vcmask 785408  }
   0xe   : > { %v2802_v1 = vld [vmem:[%s462_s18] sm:$0xff]  ;;  %v2804_v2 = vld [vmem:[%s462_s18 + $0x8] sm:$0xff]  ;;  %v2642_v16 = vld [vmem:[%s3204_s4 + $0x18] sm:$0xff]   ;;  %vm1878_vm4 = vcmask 1043456   ;;  %vm1871_vm5 = vcmask 424960   ;;  %vm1959_vm6 = vcmask 1046528  }
   0xf   : > { %v2808_v3 = vpack.c.bf16 %v2804_v2, %v2802_v1  ;;  %v2639_v11 = vld [vmem:[%s3202_s2 + $0x8] sm:$0xff]   ;;  %v2641_v13 = vld [vmem:[%s3202_s2] sm:$0xff]   ;;  %v2643_v22 = vld [vmem:[%s3204_s4 + $0x10] sm:$0xff]   ;;  %s2990_s22 = scalar_lea.vmem %s3214_s14, %s2621_s19  ;;  %1848 = vrot.lane.b32.xlu0 %v2802_v1, %s2705_s24  ;;  %vm1967_vm7 = vcmask 1045504   ;;  %vm1980_vm8 = vcmask 1044480   ;;  %vm1976_vm9 = vcmask 105472  }
  0x10   : > { %v2141_v26 = vld [vmem:[%s3201_s1 + $0x8] sm:$0xf]  ;;  %v2646_v28 = vld [vmem:[%s3202_s2 + $0x58] sm:$0xff]   ;;  %v2645_v29 = vld [vmem:[%s3204_s4] sm:$0xff]   ;;  %1856 = vrot.lane.b32.xlu1 %v2802_v1, %s2706_s25 }
  0x11   : > { %2388 = vmatpush3.bf16.msra.mxu0 %v2808_v3  ;;  %2394 = vmatpush3.bf16.msra.mxu1 %v2808_v3  ;;  %v2644_v27 = vld [vmem:[%s3204_s4 + $0x8] sm:$0xff]   ;;  %v2647_v30 = vld [vmem:[%s3202_s2 + $0x50] sm:$0xff]   ;;  %v2649_v32 = vld [vmem:[%s3202_s2 + $0x40] sm:$0xff]  }
  0x12   : > { %2399 = vmatprep.subr.bf16.mxu0 %v2703_v0  ;;  %2411 = vmatprep.subr.bf16.mxu1 %v2703_v0  ;;  %v2648_v31 = vld [vmem:[%s3202_s2 + $0x48] sm:$0xff]   ;;  %v2157_v47 = vld [vmem:[%s3205_s5] ss:$0 sm:$0xff]  ;;  %v2652_v59 = vld [vmem:[%s3207_s7 + $0x58] sm:$0xff]  }
  0x13   : > { %v2650_v57 = vld [vmem:[%s3206_s6] sm:$0xff]   ;;  %v2651_v58 = vld [vmem:[%s3206_s6 + $0x8] sm:$0xff]   ;;  %v2654_v61 = vld [vmem:[%s3207_s7 + $0x50] sm:$0xff]   ;;  %1850 = vrot.lane.b32.xlu0 %v2804_v2, %s2705_s24 }
  0x14   : > { %2390 = vmatmul.mubr.msk.bf16.vlgmr.msra.gmra.mxu0 %vm473_vm1, %v472_v4  ;;  %2396 = vmatmul.mubr.msk.bf16.vlgmr.msra.gmra.mxu1 %vm473_vm1, %v2121_v5  ;;  %v2653_v60 = vld [vmem:[%s3207_s7 + $0x28] sm:$0xff]   ;;  %v2655_v62 = vld [vmem:[%s3207_s7 + $0x20] sm:$0xff]   ;;  %v2659_v5 = vld [vmem:[%s3207_s7 + $0x10] sm:$0xff]  }
  0x15   : > { %2400 = vmatpush3.bf16.msra.mxu0 %v2634_v6  ;;  %2412 = vmatpush3.bf16.msra.mxu1 %v2635_v7  ;;  %v2656_v63 = vld [vmem:[%s3207_s7 + $0x48] sm:$0xff]   ;;  %v2658_v4 = vld [vmem:[%s3207_s7 + $0x40] sm:$0xff]   ;;  %v2660_v6 = vld [vmem:[%s3207_s7 + $0x38] sm:$0xff]  }
  0x16   : > { %2401 = vmatprep.subr.bf16.mxu0 %v2703_v0  ;;  %2413 = vmatprep.subr.bf16.mxu1 %v2703_v0  ;;  %v2661_v7 = vld [vmem:[%s3207_s7 + $0x8] sm:$0xff]  }
  0x17   : > { %2407 = vmatprep.mubr.msk.bf16.mxu0 %vm2704_vm0, %v2703_v0  ;;  %2419 = vmatprep.mubr.msk.bf16.mxu1 %vm2704_vm0, %v2703_v0 }
  0x18   : > { %1858 = vrot.lane.b32.xlu1 %v2804_v2, %s2706_s25 }
  0x19   : > { %2402 = vmatpush3.bf16.msra.mxu0 %v2636_v8  ;;  %2414 = vmatpush3.bf16.msra.mxu1 %v2637_v9  ;;  %v2662_v8 = vld [vmem:[%s3207_s7 + $0x30] sm:$0xff]   ;;  %v2663_v9 = vld [vmem:[%s3207_s7] sm:$0xff]  }
  0x1a   : > { %2403 = vmatprep.subr.bf16.mxu0 %v2703_v0  ;;  %2415 = vmatprep.subr.bf16.mxu1 %v2703_v0 }
  0x1d   : > { %2404 = vmatpush3.bf16.msra.mxu0 %v2638_v10  ;;  %2416 = vmatpush3.bf16.msra.mxu1 %v2639_v11  ;;  %v2156_v11 = vld [vmem:[%s3203_s3] ss:$0 sm:$0xff] }
  0x1e   : > { %2405 = vmatprep.subr.bf16.mxu0 %v2703_v0  ;;  %2417 = vmatprep.subr.bf16.mxu1 %v2703_v0 }
  0x21   : > { %2406 = vmatpush3.bf16.msra.mxu0 %v2640_v12  ;;  %2418 = vmatpush3.bf16.msra.mxu1 %v2641_v13 }
  0x22   : > { %2441 = vmatprep.subr.bf16.mxu0 %v2703_v0  ;;  %2423 = vmatprep.subr.bf16.mxu1 %v2703_v0 }
  0xd4   : > { %v511_v14 = vpop.f32.mrf.mxu0  ;;  %v565_v15 = vpop.f32.mrf.mxu1 }
  0xd5   : > { %v517_v17 = vpack.c.bf16 %v511_v14, %v511_v14  ;;  %v571_v18 = vpack.c.bf16 %v565_v15, %v565_v15 }
  0xd6   : > { %v2397_v19 = vpop.f32.mrf.mxu1  ;;  %v2391_v20 = vpop.f32.mrf.mxu0 }
  0xd7   : > { %2408 = vmatmul.mubr.msk.bf16.vlgmr.msra.gmra.mxu0 %vm605_vm2, %v571_v18  ;;  %2420 = vmatmul.mubr.msk.bf16.vlgmr.msra.gmra.mxu1 %vm605_vm2, %v517_v17 }
  0xd8   : > { %2442 = vmatpush3.bf16.msra.mxu0 %v2642_v16  ;;  %v568_v21 = vpop.f32.mrf.mxu1  ;;  %2424 = vmatpush3.bf16.msra.mxu1 %v2808_v3  ;;  %v514_v23 = vpop.f32.mrf.mxu0 }
  0xd9   : > { %2443 = vmatprep.subr.bf16.mxu0 %v2703_v0  ;;  %2425 = vmatprep.mubr.msk.bf16.mxu1 %vm2704_vm0, %v2703_v0 }
  0xda   : > { %v2398_v24 = vpop.f32.mrf.mxu1  ;;  %2449 = vmatprep.mubr.msk.bf16.mxu0 %vm2704_vm0, %v2703_v0  ;;  %v2392_v25 = vpop.f32.mrf.mxu0  ;;  %2429 = vmatprep.subr.bf16.mxu1 %v2703_v0 }
  0xdc   : > { %2444 = vmatpush3.bf16.msra.mxu0 %v2643_v22 }
  0xdd   : > { %2445 = vmatprep.subr.bf16.mxu0 %v2703_v0 }
  0xdf   : > { %2426 = vmatmul.mubr.msk.bf16.vlgmr.msra.gmra.mxu1 %vm473_vm1, %v2141_v26  ;;  %v2665_v26 = vld [vmem:[%s3207_s7 + $0x88] sm:$0xff]  }
  0xe0   : > { %2446 = vmatpush3.bf16.msra.mxu0 %v2644_v27  ;;  %2430 = vmatpush3.bf16.msra.mxu1 %v2646_v28 }
  0xe1   : > { %2447 = vmatprep.subr.bf16.mxu0 %v2703_v0  ;;  %2431 = vmatprep.subr.bf16.mxu1 %v2703_v0 }
  0xe2   : > { %2437 = vmatprep.mubr.msk.bf16.mxu1 %vm2704_vm0, %v2703_v0 }
  0xe4   : > { %2448 = vmatpush3.bf16.msra.mxu0 %v2645_v29  ;;  %2432 = vmatpush3.bf16.msra.mxu1 %v2647_v30  ;;  %v2666_v29 = vld [vmem:[%s3207_s7 + $0x80] sm:$0xff]   ;;  %v2664_v30 = vld [vmem:[%s3206_s6 + $0x10] sm:$0xff]  }
  0xe5   : > { %2459 = vmatprep.subr.bf16.mxu0 %v2703_v0  ;;  %2433 = vmatprep.subr.bf16.mxu1 %v2703_v0 }
  0xe7   : > { %2450 = vmatmul.mubr.msk.bf16.vlgmr.msra.gmra.mxu0 %vm605_vm2, %v2808_v3  ;;  %v2657_v3 = vld [vmem:[%s3207_s7 + $0x18] sm:$0xff]  }
  0xe8   : > { %2461 = vmatprep.mubr.msk.bf16.mxu0 %vm2704_vm0, %v2703_v0  ;;  %2434 = vmatpush3.bf16.msra.mxu1 %v2648_v31  ;;  %v2667_v31 = vld [vmem:[%s3207_s7 + $0x78] sm:$0xff]  }
  0xe9   : > { %2435 = vmatprep.subr.bf16.mxu1 %v2703_v0 }
  0xec   : > { %2436 = vmatpush3.bf16.msra.mxu1 %v2649_v32  ;;  %v2668_v32 = vld [vmem:[%s3207_s7 + $0x70] sm:$0xff]  }
  0xed   : > { %2453 = vmatprep.subr.bf16.mxu1 %v2703_v0 }
 0x197   : > { %v643_v33 = vpop.f32.mrf.mxu0  ;;  %v710_v34 = vpop.f32.mrf.mxu1 }
 0x198   : > { %v2908_v35 = vadd.f32 %v710_v34, %v643_v33  ;;  %v2669_v33 = vld [vmem:[%s3207_s7 + $0x68] sm:$0xff]   ;;  %v2670_v34 = vld [vmem:[%s3207_s7 + $0x60] sm:$0xff]  }
 0x199   : > { %v2409_v36 = vpop.f32.mrf.mxu0  ;;  %v2421_v37 = vpop.f32.mrf.mxu1 }
 0x19b   : > { %v646_v38 = vpop.f32.mrf.mxu0  ;;  %v713_v39 = vpop.f32.mrf.mxu1 }
 0x19d   : > { %v2410_v40 = vpop.f32.mrf.mxu0  ;;  %v2422_v41 = vpop.f32.mrf.mxu1 }
 0x19f   : > { %v755_v42 = vpop.f32.mrf.mxu1 }
 0x1a0   : > { %v761_v43 = vpack.c.bf16 %v755_v42, %v755_v42 }
 0x1a1   : > { %v2427_v44 = vpop.f32.mrf.mxu1 }
 0x1a2   : > { %2438 = vmatmul.mubr.msk.bf16.vlgmr.msra.gmra.mxu1 %vm605_vm2, %v761_v43 }
 0x1a3   : > { %2455 = vmatprep.mubr.msk.bf16.mxu1 %vm2704_vm0, %v2703_v0  ;;  %v758_v45 = vpop.f32.mrf.mxu1 }
 0x1a5   : > { %v2428_v46 = vpop.f32.mrf.mxu1 }
 0x1a7   : > { %v924_v48 = vpop.f32.mrf.mxu0 }
 0x1a8   : > { %v925_v50 = vadd.f32 %v2157_v47, %v924_v48 }
 0x1a9   : > { %v2451_v49 = vpop.f32.mrf.mxu0 }
 0x1aa   : > { %v931_v54 = vmax.f32 %v925_v50, 0.0  ;;  %v2671_v50 = vld [vmem:[%s3210_s10 + $0x38] sm:$0xff]  }
 0x1ab   : > { %v927_v51 = vpop.f32.mrf.mxu0 }
 0x1ac   : > { %v928_v52 = vadd.f32 %v2157_v47, %v927_v51  ;;  %v2672_v51 = vld [vmem:[%s3210_s10 + $0x30] sm:$0xff]  }
 0x1ad   : > { %v2452_v53 = vpop.f32.mrf.mxu0 }
 0x1ae   : > { %v932_v55 = vmax.f32 %v928_v52, 0.0  ;;  %v2674_v52 = vld [vmem:[%s3210_s10 + $0x28] sm:$0xff]   ;;  %v2676_v53 = vld [vmem:[%s3210_s10 + $0x20] sm:$0xff]  }
 0x1b0   : > { %v2916_v56 = vpack.c.bf16 %v932_v55, %v931_v54  ;;  %v2678_v54 = vld [vmem:[%s3210_s10 + $0x18] sm:$0xff]   ;;  %v2680_v55 = vld [vmem:[%s3210_s10 + $0x10] sm:$0xff]  }
 0x1b2   : > { %2454 = vmatpush3.bf16.msra.mxu1 %v2916_v56  ;;  %2460 = vmatpush3.bf16.msra.mxu0 %v2916_v56 }
 0x1b3   : > { %2465 = vmatprep.subr.bf16.mxu1 %v2703_v0  ;;  %2481 = vmatprep.subr.bf16.mxu0 %v2703_v0 }
 0x1b5   : > { %2456 = vmatmul.mubr.msk.bf16.vlgmr.msra.gmra.mxu1 %vm473_vm1, %v2650_v57  ;;  %2462 = vmatmul.mubr.msk.bf16.vlgmr.msra.gmra.mxu0 %vm473_vm1, %v2651_v58 }
 0x1b6   : > { %2477 = vmatprep.mubr.msk.bf16.mxu1 %vm2704_vm0, %v2703_v0  ;;  %2493 = vmatprep.mubr.msk.bf16.mxu0 %vm2704_vm0, %v2703_v0 }
 0x1b7   : > { %2466 = vmatpush3.bf16.msra.mxu1 %v2652_v59  ;;  %2482 = vmatpush3.bf16.msra.mxu0 %v2653_v60  ;;  %v2218_v59 = vld [vmem:[%s3208_s8] ss:$0 sm:$0xff] }
 0x1b8   : > { %2467 = vmatprep.subr.bf16.mxu1 %v2703_v0  ;;  %2483 = vmatprep.subr.bf16.mxu0 %v2703_v0 }
 0x1bb   : > { %2468 = vmatpush3.bf16.msra.mxu1 %v2654_v61  ;;  %2484 = vmatpush3.bf16.msra.mxu0 %v2655_v62 }
 0x1bc   : > { %2469 = vmatprep.subr.bf16.mxu1 %v2703_v0  ;;  %2485 = vmatprep.subr.bf16.mxu0 %v2703_v0 }
 0x1bf   : > { %2470 = vmatpush3.bf16.msra.mxu1 %v2656_v63  ;;  %2486 = vmatpush3.bf16.msra.mxu0 %v2657_v3 }
 0x1c0   : > { %2471 = vmatprep.subr.bf16.mxu1 %v2703_v0  ;;  %2487 = vmatprep.subr.bf16.mxu0 %v2703_v0 }
 0x1c3   : > { %2472 = vmatpush3.bf16.msra.mxu1 %v2658_v4  ;;  %2488 = vmatpush3.bf16.msra.mxu0 %v2659_v5 }
 0x1c4   : > { %2473 = vmatprep.subr.bf16.mxu1 %v2703_v0  ;;  %2489 = vmatprep.subr.bf16.mxu0 %v2703_v0 }
 0x1c7   : > { %2474 = vmatpush3.bf16.msra.mxu1 %v2660_v6  ;;  %2490 = vmatpush3.bf16.msra.mxu0 %v2661_v7 }
 0x1c8   : > { %2475 = vmatprep.subr.bf16.mxu1 %v2703_v0  ;;  %2491 = vmatprep.subr.bf16.mxu0 %v2703_v0 }
 0x1cb   : > { %2476 = vmatpush3.bf16.msra.mxu1 %v2662_v8  ;;  %2492 = vmatpush3.bf16.msra.mxu0 %v2663_v9  ;;  %v1385_v8 = vld [vmem:[%s3209_s9] sm:$0xf]  ;;  %v2220_v9 = vld [vmem:[%s3209_s9 + $0x4] sm:$0xf] }
 0x1cc   : > { %2497 = vmatprep.subr.bf16.mxu1 %v2703_v0  ;;  %2503 = vmatprep.subr.bf16.mxu0 %v2703_v0 }
 0x262   : > { %v832_v10 = vpop.f32.mrf.mxu1 }
 0x263   : > { %v838_v12 = vadd.f32 %v832_v10, %v2908_v35  ;;  %v2673_v10 = vld [vmem:[%s3210_s10 + $0x78] sm:$0xff]  }
 0x264   : > { %v2439_v13 = vpop.f32.mrf.mxu1 }
 0x265   : > { %v846_v14 = vadd.f32 %v2156_v11, %v838_v12  ;;  %v2675_v11 = vld [vmem:[%s3210_s10 + $0x70] sm:$0xff]   ;;  %v2677_v12 = vld [vmem:[%s3210_s10 + $0x68] sm:$0xff]   ;;  %v2679_v13 = vld [vmem:[%s3210_s10 + $0x60] sm:$0xff]  }
 0x266   : > { %v835_v15 = vpop.f32.mrf.mxu1 }
 0x267   : > { %v847_v16 = vmax.f32 %v846_v14, 0.0  ;;  %v2681_v14 = vld [vmem:[%s3210_s10 + $0x58] sm:$0xff]   ;;  %v2683_v15 = vld [vmem:[%s3210_s10 + $0x50] sm:$0xff]  }
 0x268   : > { %v2440_v17 = vpop.f32.mrf.mxu1 }
 0x269   : > { %2054 = vst [vmem:[%s2990_s22] sm:$0x7f] %v847_v16  ;;  %v2684_v16 = vld [vmem:[%s3210_s10] sm:$0xff]   ;;  %v2685_v17 = vld [vmem:[%s3210_s10 + $0x48] sm:$0xff]  }
 0x275   : > { %v978_v18 = vpop.f32.mrf.mxu1  ;;  %v1043_v19 = vpop.f32.mrf.mxu0 }
 0x277   : > { %v2457_v20 = vpop.f32.mrf.mxu1  ;;  %v2463_v21 = vpop.f32.mrf.mxu0 }
 0x278   : > { %v2687_v20 = vld [vmem:[%s3210_s10 + $0xb8] sm:$0xff]  }
 0x279   : > { %v981_v22 = vpop.f32.mrf.mxu1  ;;  %v1046_v23 = vpop.f32.mrf.mxu0 }
 0x27a   : > { %v985_v24 = vpack.c.bf16 %v981_v22, %v978_v18  ;;  %v1050_v25 = vpack.c.bf16 %v1046_v23, %v1043_v19  ;;  %v2686_v18 = vld [vmem:[%s3210_s10 + $0x40] sm:$0xff]  }
 0x27b   : > { %v2464_v27 = vpop.f32.mrf.mxu0  ;;  %v2458_v28 = vpop.f32.mrf.mxu1 }
 0x27c   : > { %2478 = vmatmul.mubr.msk.bf16.vlgmr.msra.gmra.mxu1 %vm1100_vm3, %v1050_v25  ;;  %2494 = vmatmul.mubr.msk.bf16.vlgmr.msra.gmra.mxu0 %vm1100_vm3, %v985_v24  ;;  %v2688_v24 = vld [vmem:[%s3210_s10 + $0xb0] sm:$0xff]   ;;  %v1849_v28 = vpop.permute.xlu0 %1848 }
 0x27d   : > { %2498 = vmatpush3.bf16.msra.mxu1 %v2916_v56  ;;  %2499 = vmatprep.mubr.msk.bf16.mxu1 %vm2704_vm0, %v2703_v0  ;;  %v2682_v56 = vld [vmem:[%s3210_s10 + $0x8] sm:$0xff]  }
 0x27e   : > { %2504 = vmatpush3.bf16.msra.mxu0 %v2665_v26  ;;  %2515 = vmatprep.mubr.msk.bf16.mxu0 %vm2704_vm0, %v2703_v0 }
 0x27f   : > { %2505 = vmatprep.subr.bf16.mxu0 %v2703_v0  ;;  %2519 = vmatprep.subr.bf16.mxu1 %v2703_v0 }
 0x282   : > { %2506 = vmatpush3.bf16.msra.mxu0 %v2666_v29  ;;  %v2689_v29 = vld [vmem:[%s3210_s10 + $0xa8] sm:$0xff]  }
 0x283   : > { %2507 = vmatprep.subr.bf16.mxu0 %v2703_v0 }
 0x284   : > { %2500 = vmatmul.mubr.msk.bf16.vlgmr.msra.gmra.mxu1 %vm473_vm1, %v2664_v30 }
 0x285   : > { %2521 = vmatprep.mubr.msk.bf16.mxu1 %vm2704_vm0, %v2703_v0 }
 0x286   : > { %2508 = vmatpush3.bf16.msra.mxu0 %v2667_v31  ;;  %v1870_v31 = vld [vmem:[%s3212_s12 + $0x30] sm:$0xf] }
 0x287   : > { %2509 = vmatprep.subr.bf16.mxu0 %v2703_v0 }
 0x28a   : > { %2510 = vmatpush3.bf16.msra.mxu0 %v2668_v32 }
 0x28b   : > { %2511 = vmatprep.subr.bf16.mxu0 %v2703_v0 }
 0x28e   : > { %2512 = vmatpush3.bf16.msra.mxu0 %v2669_v33  ;;  %v1854_v33 = vmax.f32 %v2802_v1, %v1849_v28  ;;  %v1868_v1 = vld [vmem:[%s3212_s12 + $0x20] sm:$0xff] }
 0x28f   : > { %2513 = vmatprep.subr.bf16.mxu0 %v2703_v0 }
 0x292   : > { %2514 = vmatpush3.bf16.msra.mxu0 %v2670_v34  ;;  %v1857_v34 = vpop.permute.xlu1 %1856 }
 0x293   : > { %2551 = vmatprep.subr.bf16.mxu0 %v2703_v0 }
 0x33c   : > { %v1138_v35 = vpop.f32.mrf.mxu1  ;;  %v1218_v36 = vpop.f32.mrf.mxu0 }
 0x33d   : > { %v1219_v37 = vadd.f32 %v1218_v36, %v1138_v35  ;;  %v2254_v36 = vld [vmem:[%s3209_s9 + $0x8] sm:$0xf] }
 0x33e   : > { %v2479_v38 = vpop.f32.mrf.mxu1  ;;  %v2495_v39 = vpop.f32.mrf.mxu0 }
 0x33f   : > { %v1869_v38 = vld [vmem:[%s3212_s12 + $0x28] sm:$0xff]  ;;  %v1867_v39 = vld [vmem:[%s3212_s12 + $0x18] sm:$0xff] }
 0x340   : > { %v1141_v40 = vpop.f32.mrf.mxu1  ;;  %v1221_v41 = vpop.f32.mrf.mxu0 }
 0x341   : > { %v1222_v42 = vadd.f32 %v1221_v41, %v1141_v40  ;;  %v1851_v40 = vpop.permute.xlu0 %1850  ;;  %v1866_v41 = vld [vmem:[%s3212_s12 + $0x10] sm:$0xff] }
 0x342   : > { %v2480_v43 = vpop.f32.mrf.mxu1  ;;  %v2496_v44 = vpop.f32.mrf.mxu0 }
 0x343   : > { %v1865_v43 = vld [vmem:[%s3212_s12 + $0x8] sm:$0xff]  ;;  %v1859_v44 = vpop.permute.xlu1 %1858 }
 0x344   : > { %v1270_v45 = vpop.f32.mrf.mxu1 }
 0x346   : > { %v2501_v46 = vpop.f32.mrf.mxu1 }
 0x348   : > { %v1273_v47 = vpop.f32.mrf.mxu1 }
 0x349   : > { %v1277_v48 = vpack.c.bf16 %v1273_v47, %v1270_v45  ;;  %v1864_v45 = vld [vmem:[%s3212_s12] sm:$0xff]  ;;  %v2691_v47 = vld [vmem:[%s3210_s10 + $0x98] sm:$0xff]  }
 0x34a   : > { %v2502_v49 = vpop.f32.mrf.mxu1 }
 0x34b   : > { %2516 = vmatmul.mubr.msk.bf16.vlgmr.msra.gmra.mxu0 %vm1100_vm3, %v1277_v48  ;;  %v2692_v48 = vld [vmem:[%s3210_s10 + $0x90] sm:$0xff]   ;;  %v2693_v49 = vld [vmem:[%s3210_s10 + $0x88] sm:$0xff]  }
 0x34c   : > { %2567 = vmatprep.mubr.msk.bf16.mxu0 %vm2704_vm0, %v2703_v0  ;;  %2552 = vmatpush3.bf16.msra.mxu0 %v2671_v50  ;;  %v2694_v50 = vld [vmem:[%s3210_s10 + $0x80] sm:$0xff]  }
 0x34d   : > { %2553 = vmatprep.subr.bf16.mxu0 %v2703_v0 }
 0x350   : > { %2554 = vmatpush3.bf16.msra.mxu0 %v2672_v51 }
 0x351   : > { %2555 = vmatprep.subr.bf16.mxu0 %v2703_v0 }
 0x354   : > { %2556 = vmatpush3.bf16.msra.mxu0 %v2674_v52 }
 0x355   : > { %2557 = vmatprep.subr.bf16.mxu0 %v2703_v0 }
 0x358   : > { %2558 = vmatpush3.bf16.msra.mxu0 %v2676_v53 }
 0x359   : > { %2559 = vmatprep.subr.bf16.mxu0 %v2703_v0 }
 0x35c   : > { %2560 = vmatpush3.bf16.msra.mxu0 %v2678_v54 }
 0x35d   : > { %2561 = vmatprep.subr.bf16.mxu0 %v2703_v0 }
 0x360   : > { %2562 = vmatpush3.bf16.msra.mxu0 %v2680_v55 }
 0x361   : > { %2563 = vmatprep.subr.bf16.mxu0 %v2703_v0 }
 0x364   : > { %2564 = vmatpush3.bf16.msra.mxu0 %v2682_v56 }
 0x365   : > { %2565 = vmatprep.subr.bf16.mxu0 %v2703_v0 }
 0x368   : > { %2566 = vmatpush3.bf16.msra.mxu0 %v2684_v16  ;;  %v1975_v16 = vld [vmem:[%s3213_s13] sm:$0x7f] }
 0x369   : > { %2577 = vmatprep.subr.bf16.mxu0 %v2703_v0 }
 0x40b   : > { %v1364_v57 = vpop.f32.mrf.mxu0 }
 0x40c   : > { %v1371_v58 = vadd.f32 %v1364_v57, %v1219_v37  ;;  %v1862_v37 = vmax.f32 %v1854_v33, %v1857_v34 }
 0x40d   : > { %v2517_v60 = vpop.f32.mrf.mxu0 }
 0x40e   : > { %v1380_v62 = vadd.f32 %v2218_v59, %v1371_v58 }
 0x40f   : > { %v1367_v61 = vpop.f32.mrf.mxu0 }
 0x410   : > { %v1372_v63 = vadd.f32 %v1367_v61, %v1222_v42  ;;  %v1382_v5 = vmax.f32 %v1380_v62, 0.0  ;;  %v1855_v42 = vmax.f32 %v2804_v2, %v1851_v40  ;;  %v2690_v2 = vld [vmem:[%s3210_s10 + $0xa0] sm:$0xff]  }
 0x411   : > { %v2518_v3 = vpop.f32.mrf.mxu0 }
 0x412   : > { %v1381_v4 = vadd.f32 %v2218_v59, %v1372_v63  ;;  %v1863_v46 = vmax.f32 %v1855_v42, %v1859_v44 }
 0x414   : > { %v1383_v6 = vmax.f32 %v1381_v4, 0.0 }
 0x416   : > { %v1384_v7 = vpack.c.bf16 %v1383_v6, %v1382_v5 }
 0x418   : > { %2520 = vmatpush3.bf16.msra.mxu1 %v1384_v7 }
 0x419   : > { %2525 = vmatprep.subr.bf16.mxu1 %v2703_v0 }
 0x41b   : > { %2522 = vmatmul.mubr.msk.bf16.vlgmr.msra.gmra.mxu1 %vm473_vm1, %v1385_v8 }
 0x41c   : > { %2526 = vmatpush3.bf16.msra.mxu1 %v1384_v7  ;;  %2527 = vmatprep.mubr.msk.bf16.mxu1 %vm2704_vm0, %v2703_v0 }
 0x41d   : > { %2531 = vmatprep.subr.bf16.mxu1 %v2703_v0 }
 0x423   : > { %2528 = vmatmul.mubr.msk.bf16.vlgmr.msra.gmra.mxu1 %vm473_vm1, %v2220_v9 }
 0x424   : > { %2532 = vmatpush3.bf16.msra.mxu1 %v2673_v10  ;;  %2547 = vmatprep.mubr.msk.bf16.mxu1 %vm2704_vm0, %v2703_v0 }
 0x425   : > { %2533 = vmatprep.subr.bf16.mxu1 %v2703_v0 }
 0x428   : > { %2534 = vmatpush3.bf16.msra.mxu1 %v2675_v11 }
 0x429   : > { %2535 = vmatprep.subr.bf16.mxu1 %v2703_v0 }
 0x42c   : > { %2536 = vmatpush3.bf16.msra.mxu1 %v2677_v12 }
 0x42d   : > { %2537 = vmatprep.subr.bf16.mxu1 %v2703_v0 }
 0x430   : > { %2538 = vmatpush3.bf16.msra.mxu1 %v2679_v13 }
 0x431   : > { %2539 = vmatprep.subr.bf16.mxu1 %v2703_v0 }
 0x434   : > { %2540 = vmatpush3.bf16.msra.mxu1 %v2681_v14 }
 0x435   : > { %2541 = vmatprep.subr.bf16.mxu1 %v2703_v0 }
 0x438   : > { %2542 = vmatpush3.bf16.msra.mxu1 %v2683_v15 }
 0x439   : > { %2543 = vmatprep.subr.bf16.mxu1 %v2703_v0 }
 0x43c   : > { %2544 = vmatpush3.bf16.msra.mxu1 %v2685_v17 }
 0x43d   : > { %2545 = vmatprep.subr.bf16.mxu1 %v2703_v0 }
 0x440   : > { %2546 = vmatpush3.bf16.msra.mxu1 %v2686_v18  ;;  %v2280_v18 = vld [vmem:[%s3211_s11] ss:$0 sm:$0xff] }
 0x441   : > { %2571 = vmatprep.subr.bf16.mxu1 %v2703_v0 }
 0x4db   : > { %v1423_v19 = vpop.f32.mrf.mxu1 }
 0x4dc   : > { %v1429_v21 = vpack.c.bf16 %v1423_v19, %v1423_v19 }
 0x4dd   : > { %v2523_v22 = vpop.f32.mrf.mxu1 }
 0x4de   : > { %2568 = vmatmul.mubr.bf16.vlgmr.msra.gmra.mxu0 %v1429_v21 }
 0x4df   : > { %v1426_v23 = vpop.f32.mrf.mxu1  ;;  %2578 = vmatpush3.bf16.msra.mxu0 %v2687_v20  ;;  %2593 = vmatprep.mubr.msk.bf16.mxu0 %vm2704_vm0, %v2703_v0 }
 0x4e0   : > { %2579 = vmatprep.subr.bf16.mxu0 %v2703_v0 }
 0x4e1   : > { %v2524_v25 = vpop.f32.mrf.mxu1 }
 0x4e3   : > { %v1485_v26 = vpop.f32.mrf.mxu1  ;;  %2580 = vmatpush3.bf16.msra.mxu0 %v2688_v24 }
 0x4e4   : > { %v1491_v27 = vpack.c.bf16 %v1485_v26, %v1485_v26  ;;  %2581 = vmatprep.subr.bf16.mxu0 %v2703_v0 }
 0x4e5   : > { %v2529_v30 = vpop.f32.mrf.mxu1 }
 0x4e6   : > { %2548 = vmatmul.mubr.bf16.vlgmr.msra.gmra.mxu1 %v1491_v27 }
 0x4e7   : > { %2572 = vmatpush3.bf16.msra.mxu1 %v1384_v7  ;;  %v1488_v32 = vpop.f32.mrf.mxu1  ;;  %2573 = vmatprep.mubr.msk.bf16.mxu1 %vm2704_vm0, %v2703_v0 }
 0x4e8   : > { %2597 = vmatprep.subr.msk.mxu1 %vm1878_vm4, %v1870_v31  ;;  %2582 = vmatpush3.bf16.msra.mxu0 %v2689_v29 }
 0x4e9   : > { %v2530_v35 = vpop.f32.mrf.mxu1  ;;  %2583 = vmatprep.subr.bf16.mxu0 %v2703_v0 }
 0x4ec   : > { %2584 = vmatpush3.bf16.msra.mxu0 %v2690_v2 }
 0x4ed   : > { %2585 = vmatprep.subr.bf16.mxu0 %v2703_v0 }
 0x4ee   : > { %2574 = vmatmul.mubr.msk.bf16.vlgmr.msra.gmra.mxu1 %vm473_vm1, %v2254_v36 }
 0x4ef   : > { %2598 = vmatpush3.msk.msra.mxu1 %vm1878_vm4, %v1870_v31  ;;  %2611 = vmatprep.mubr.msk.f32.mxu1 %vm1871_vm5, %v1862_v37 }
 0x4f0   : > { %2599 = vmatprep.subr.mxu1 %v1869_v38  ;;  %2586 = vmatpush3.bf16.msra.mxu0 %v2691_v47 }
 0x4f1   : > { %2600 = vmatpush3.msra.mxu1 %v1869_v38  ;;  %2587 = vmatprep.subr.bf16.mxu0 %v2703_v0 }
 0x4f2   : > { %2601 = vmatprep.subr.mxu1 %v1868_v1 }
 0x4f3   : > { %2602 = vmatpush3.msra.mxu1 %v1868_v1 }
 0x4f4   : > { %2603 = vmatprep.subr.mxu1 %v1867_v39  ;;  %2588 = vmatpush3.bf16.msra.mxu0 %v2692_v48 }
 0x4f5   : > { %2604 = vmatpush3.msra.mxu1 %v1867_v39  ;;  %2589 = vmatprep.subr.bf16.mxu0 %v2703_v0 }
 0x4f6   : > { %2605 = vmatprep.subr.mxu1 %v1866_v41 }
 0x4f7   : > { %2606 = vmatpush3.msra.mxu1 %v1866_v41 }
 0x4f8   : > { %2607 = vmatprep.subr.mxu1 %v1865_v43  ;;  %2590 = vmatpush3.bf16.msra.mxu0 %v2693_v49 }
 0x4f9   : > { %2608 = vmatpush3.msra.mxu1 %v1865_v43  ;;  %2591 = vmatprep.subr.bf16.mxu0 %v2703_v0 }
 0x4fa   : > { %2609 = vmatprep.subr.mxu1 %v1864_v45 }
 0x4fb   : > { %2610 = vmatpush3.msra.mxu1 %v1864_v45 }
 0x4fc   : > { %2612 = vmatmul.mubr.msk.f32.vlgmr.msra.gmra.mxu1 %vm1871_vm5, %v1863_v46  ;;  %2614 = vmatprep.subr.mxu1 %v2703_v0 }
 0x4fd   : > { %2618 = vmatprep.mubr.msk.f32.mxu1 %vm2704_vm0, %v2703_v0  ;;  %2592 = vmatpush3.bf16.msra.mxu0 %v2694_v50 }
 0x59e   : > { %v1679_v51 = vpop.f32.mrf.mxu0 }
 0x5a0   : > { %v2569_v52 = vpop.f32.mrf.mxu0 }
 0x5a2   : > { %v1682_v53 = vpop.f32.mrf.mxu0 }
 0x5a4   : > { %v2570_v54 = vpop.f32.mrf.mxu0 }
 0x5a6   : > { %v1591_v55 = vpop.f32.mrf.mxu1 }
 0x5a7   : > { %v1680_v56 = vadd.f32 %v1679_v51, %v1591_v55 }
 0x5a8   : > { %v2549_v57 = vpop.f32.mrf.mxu1 }
 0x5aa   : > { %v1594_v58 = vpop.f32.mrf.mxu1 }
 0x5ac   : > { %v2550_v59 = vpop.f32.mrf.mxu1 }
 0x5ae   : > { %v1724_v60 = vpop.f32.mrf.mxu1 }
 0x5af   : > { %v1730_v61 = vpack.c.bf16 %v1724_v60, %v1724_v60 }
 0x5b0   : > { %v2575_v62 = vpop.f32.mrf.mxu1 }
 0x5b1   : > { %2594 = vmatmul.mubr.bf16.vlgmr.msra.gmra.mxu0 %v1730_v61 }
 0x5b2   : > { %v1727_v63 = vpop.f32.mrf.mxu1 }
 0x5b4   : > { %v2576_v3 = vpop.f32.mrf.mxu1 }
 0x5bc   : > { %v2613_v4 = vpop.f32.mrf.mxu1 }
 0x5bd   : > { %v1961_v5 = vrot.slane %v2613_v4, 1  ;;  %v1969_v8 = vrot.slane %v2613_v4, 2 }
 0x5be   : > { %v1948_v6 = vpop.f32.mrf.mxu1 }
 0x5bf   : > { %v1966_v7 = vmax.f32 %v2613_v4, %v1961_v5  ;;  %v1960_v9 = vrot.slane %v1948_v6, 1  ;;  %v1968_v10 = vrot.slane %v1948_v6, 2 }
 0x5c1   : > { %v1974_v11 = vmax.f32 %v1966_v7, %v1969_v8  ;;  %v1962_v12 = vsel %vm1959_vm6, %v1960_v9, %v1961_v5  ;;  %v1970_v14 = vsel %vm1967_vm7, %v1968_v10, %v1969_v8 }
 0x5c2   : > { %v1965_v13 = vmax.f32 %v1948_v6, %v1962_v12 }
 0x5c3   : > { %2615 = vmatpush3.msk.msra.mxu1 %vm1980_vm8, %v1974_v11 }
 0x5c4   : > { %v1973_v15 = vmax.f32 %v1965_v13, %v1970_v14  ;;  %2616 = vmatprep.subr.mxu1 %v2703_v0 }
 0x5c6   : > { %2617 = vmatpush3.msra.mxu1 %v1973_v15 }
 0x5c7   : > { %2619 = vmatmul.mubr.msk.f32.vlgmr.msra.gmra.mxu1 %vm1976_vm9, %v1975_v16 }
 0x671   : > { %v1830_v17 = vpop.f32.mrf.mxu0 }
 0x672   : > { %v1836_v19 = vadd.f32 %v1830_v17, %v1680_v56 }
 0x673   : > { %v2595_v20 = vpop.f32.mrf.mxu0 }
 0x674   : > { %v1844_v21 = vadd.f32 %v2280_v18, %v1836_v19 }
 0x675   : > { %v1833_v22 = vpop.f32.mrf.mxu0 }
 0x676   : > { %v1845_v23 = vmax.f32 %v1844_v21, 0.0 }
 0x677   : > { %v2596_v24 = vpop.f32.mrf.mxu0 }
 0x678   : > { %2055 = vst [vmem:[%s2990_s22 + $0x8] sm:$0x7f] %v1845_v23 }
 0x687   : > { %v2050_v0 = vpop.f32.mrf.mxu1 }
 0x688   : > { %2056 = vst [vmem:[%s2990_s22 + $0x10] sm:$0x7f] %v2050_v0 }
 0x689   : > { %v2620_v25 = vpop.f32.mrf.mxu1 }
 0x68a PF: > { %s24_s29 = sadd.s32 1, %s2701_s29  }
 0x68b   : > { %p21_p4 = scmp.ge.s32.totalorder %s24_s29, 4  }
 0x68d   :  { %23 = sbr.rel (!%p21_p4) target bundleno = 1 (0x1), region = 118 }

</bundles_post_ra>
